<compile_context>
chip_gen: v7x
topology: tpu7x:2x2x1
jax: 0.10.0
libtpu: 0.0.40
codegen_flags: <defaults>
</compile_context>

<pallas_src>
import functools

import jax
import jax.numpy as jnp
from jax import lax
from jax.experimental import pallas as pl
from jax.experimental.pallas import tpu as pltpu

TEMPERATURE = 0.07
BASE_TEMPERATURE = 0.07  # hyper-parameter; unused by the reference forward


def _sentence_pairs_kernel(lab_r_ref, lab_c_ref, feat_ref, out_ref, *,
                           inv_temperature, mask_eps, tm):
    """One grid step = one (tm, N) row tile; writes per-row log(pos/(pos+neg))."""
    i = pl.program_id(0)
    r0 = pl.multiple_of(i * tm, tm)

    f_all = feat_ref[...]                                    # (N, D) f32, resident
    f_rows = feat_ref[pl.ds(r0, tm), :]                      # (tm, D)
    f_rows_scaled = f_rows * inv_temperature                 # fold 1/T (O(tm*D))

    # tmp = (anchor_rows @ contrast.T) / temperature  -- MXU, f32 accumulate.
    tmp = lax.dot_general(f_rows_scaled, f_all, (((1,), (1,)), ((), ())),
                          preferred_element_type=jnp.float32)  # (tm, N)

    # Reference normalization: tmp / rowmax(tmp) - 1, then exp.
    row_max = jnp.max(tmp, axis=1, keepdims=True)            # (tm, 1)
    inv_max = 1.0 / row_max                                   # O(tm) divide
    sim = jnp.exp(tmp * inv_max - 1.0)                        # (tm, N)  EUP

    # Diagonal (self-similarity) rebuilt in O(tm*D) from the features instead of
    # carving it out of the N x N tile with an iota/logits_mask.
    diag_tmp = jnp.sum(f_rows * f_rows_scaled, axis=1, keepdims=True)  # (tm, 1)
    diag_sim = jnp.exp(diag_tmp * inv_max - 1.0)              # (tm, 1)

    # Boolean label mask, kept boolean until the single select.
    mask_bool = lab_r_ref[...] == lab_c_ref[...]              # (tm, N)

    row_sum = jnp.sum(sim, axis=1, keepdims=True)             # sum_j sim_ij
    pos_sum = jnp.sum(jnp.where(mask_bool, sim, 0.0), axis=1, keepdims=True)

    # denom == pos + neg of the reference (mask_pos + mask_neg == logits_mask).
    denom = row_sum - diag_sim
    # eq-mask always contains the diagonal -> subtract it; +eps matches `.add(1e-07)`.
    pos = (pos_sum - diag_sim) + mask_eps * denom

    out_ref[...] = jnp.log(pos / denom)                       # (tm, 1)


def _pick_row_tile(n, row_tile):
    if row_tile is not None:
        if n % row_tile != 0:
            raise ValueError(f"row_tile={row_tile} must divide N={n}")
        return int(row_tile)
    if n % 8 != 0:
        return n  # single full-height block (block == full dims is always legal)
    tm = min(n, 512)
    tm -= tm % 8
    while n % tm != 0:
        tm -= 8
    return tm


def sentence_pairs_loss(features, labels=None, mask=None, *,
                        temperature=TEMPERATURE, contrast_mode="all",
                        base_temperature=BASE_TEMPERATURE, row_tile=None):
    """features: (bsz, n_views, ...) ; labels: (bsz,) ints (or None -> eye mask)."""
    del base_temperature  # unused by the reference forward
    if features.ndim < 3:
        raise ValueError("`features` needs to be [bsz, n_views, ...], "
                         "at least 3 dimensions are required")
    if features.ndim > 3:
        features = features.reshape(features.shape[0], features.shape[1], -1)
    if labels is not None and mask is not None:
        raise ValueError("Cannot define both `labels` and `mask`")
    if mask is not None:
        # TODO(synk): explicit dense-`mask` path (arbitrary float mask) not ported.
        raise NotImplementedError("explicit `mask` path not implemented")
    if contrast_mode != "all":
        # TODO(synk): contrast_mode='one' (anchor = first view only) not ported.
        raise NotImplementedError("only contrast_mode='all' is implemented")

    bsz, n_views, dim = features.shape
    if labels is None:
        labels = jnp.arange(bsz, dtype=jnp.int32)  # eye(bsz) == eq-mask of arange
        mask_eps = 0.0                             # eye path has no +1e-7
    else:
        labels = jnp.asarray(labels).reshape(-1).astype(jnp.int32)
        if labels.shape[0] != bsz:
            raise ValueError("Num of labels does not match num of features")
        mask_eps = 1e-07

    n = bsz * n_views
    # contrast_feature = torch.cat(torch.unbind(features, dim=1), dim=0)  (view-major)
    contrast_feature = (jnp.transpose(features, (1, 0, 2))
                        .reshape(n, dim).astype(jnp.float32))
    lab = jnp.tile(labels.astype(jnp.int32), n_views)   # labels of view-major rows/cols
    lab_r = lab.reshape(n, 1)
    lab_c = lab.reshape(1, n)

    tm = _pick_row_tile(n, row_tile)
    kernel = functools.partial(_sentence_pairs_kernel,
                               inv_temperature=1.0 / float(temperature),
                               mask_eps=float(mask_eps), tm=tm)

    per_row = pl.pallas_call(
        kernel,
        grid=(n // tm,),
        in_specs=[
            pl.BlockSpec((tm, 1), lambda i: (i, 0)),    # row labels, per tile
            pl.BlockSpec((1, n), lambda i: (0, 0)),     # column labels, resident
            pl.BlockSpec((n, dim), lambda i: (0, 0)),   # contrast features, resident
        ],
        out_specs=pl.BlockSpec((tm, 1), lambda i: (i, 0)),
        out_shape=jax.ShapeDtypeStruct((n, 1), jnp.float32),
        compiler_params=pltpu.CompilerParams(
            dimension_semantics=("parallel",)),
    )(lab_r, lab_c, contrast_feature)

    return -jnp.mean(per_row)


def _reference_loss(features, labels, temperature=TEMPERATURE):
    """Pure-JAX mirror of the PyTorch forward (labels path), for sanity checking."""
    bsz, n_views, dim = features.shape
    n = bsz * n_views
    lab = labels.reshape(-1, 1)
    m = (lab == lab.T).astype(jnp.float32) + 1e-07
    cf = jnp.transpose(features, (1, 0, 2)).reshape(n, dim).astype(jnp.float32)
    m = jnp.tile(m, (n_views, n_views))
    logits_mask = 1.0 - jnp.eye(n, dtype=jnp.float32)
    mask_pos = m * logits_mask
    mask_neg = (1.0 - m) * logits_mask
    tmp = cf @ cf.T / temperature
    logits_max = jnp.max(tmp, axis=1, keepdims=True)
    tmp = tmp / logits_max - 1.0
    sim = jnp.exp(tmp)
    pos = jnp.sum(sim * mask_pos, axis=1)
    neg = jnp.sum(sim * mask_neg, axis=1)
    return -jnp.mean(jnp.log(pos / (pos + neg)))


if __name__ == "__main__":
    key = jax.random.PRNGKey(0)
    k_feat, k_lab = jax.random.split(key, 2)

    bsz, n_views, dim = 64, 2, 32          # N = 128 rows, D = 32
    features = jax.random.normal(k_feat, (bsz, n_views, dim), dtype=jnp.float32)
    # SupCon-style inputs are L2-normalized embeddings (input prep, not module logic)
    features = features / jnp.linalg.norm(features, axis=-1, keepdims=True)
    labels = jax.random.randint(k_lab, (bsz,), 0, 4)

    # row_tile=64 -> a 2-step "parallel" row grid even at this small N.
    loss = jax.block_until_ready(
        sentence_pairs_loss(features, labels, row_tile=64))
    ref = jax.block_until_ready(_reference_loss(features, labels))

    assert jnp.isfinite(loss), "kernel produced a non-finite loss"
    assert jnp.allclose(loss, ref, rtol=1e-4, atol=1e-5), (loss, ref)
    print("KERNEL_OK")
</pallas_src>

<mosaic_0001>
module attributes {stable_mosaic.version = 11 : i64} {
  func.func @_sentence_pairs_kernel(%arg0: i32, %arg1: memref<64x1xi32, #tpu.memory_space<vmem>>, %arg2: memref<1x128xi32, #tpu.memory_space<vmem>>, %arg3: memref<128x32xf32, #tpu.memory_space<vmem>>, %arg4: memref<64x1xf32, #tpu.memory_space<vmem>>) attributes {dimension_semantics = [#tpu.dimension_semantics<parallel>], iteration_bounds = array<i64: 2>, scalar_prefetch = 0 : i64, scratch_operands = 0 : i64, tpu.core_type = #tpu.core_type<tc>, window_params = [{transform_indices = @transform_0, window_bounds = array<i64: 64, 1>}, {pipeline_mode = #tpu.pipeline_mode<synchronous>, transform_indices = @transform_1, window_bounds = array<i64: 1, 128>}, {pipeline_mode = #tpu.pipeline_mode<synchronous>, transform_indices = @transform_2, window_bounds = array<i64: 128, 32>}, {transform_indices = @transform_3, window_bounds = array<i64: 64, 1>}]} {
    %c64_i32 = arith.constant 64 : i32
    %0 = arith.muli %arg0, %c64_i32 : i32
    %1 = tpu.assume_multiple %0, 64 : i32
    %c0 = arith.constant 0 : index
    %c0_0 = arith.constant 0 : index
    %2 = vector.load %arg3[%c0, %c0_0] : memref<128x32xf32, #tpu.memory_space<vmem>>, vector<128x32xf32>
    %3 = arith.index_cast %1 : i32 to index
    %c0_1 = arith.constant 0 : index
    %4 = vector.load %arg3[%3, %c0_1] : memref<128x32xf32, #tpu.memory_space<vmem>>, vector<64x32xf32>
    %cst = arith.constant 14.2857141 : f32
    %5 = vector.broadcast %cst : f32 to vector<64x32xf32>
    %6 = arith.mulf %4, %5 : vector<64x32xf32>
    %cst_2 = arith.constant dense<0.000000e+00> : vector<64x128xf32>
    %7 = tpu.matmul %6, %2, %cst_2 {dimension_numbers = #tpu.dot_dimension_numbers<[1], [1], [0], [0], [0, 0, 1, 0], [], []>} : vector<64x32xf32>, vector<128x32xf32>, vector<64x128xf32> -> vector<64x128xf32>
    %cst_3 = arith.constant dense<0xFF800000> : vector<64xf32>
    %8 = vector.multi_reduction <maximumf>, %7, %cst_3 [1] : vector<64x128xf32> to vector<64xf32>
    %9 = vector.shape_cast %8 : vector<64xf32> to vector<64x1xf32>
    %cst_4 = arith.constant 1.000000e+00 : f32
    %10 = vector.broadcast %cst_4 : f32 to vector<64x1xf32>
    %11 = arith.divf %10, %9 : vector<64x1xf32>
    %12 = vector.broadcast %11 : vector<64x1xf32> to vector<64x128xf32>
    %13 = arith.mulf %7, %12 : vector<64x128xf32>
    %cst_5 = arith.constant 1.000000e+00 : f32
    %14 = vector.broadcast %cst_5 : f32 to vector<64x128xf32>
    %15 = arith.subf %13, %14 : vector<64x128xf32>
    %16 = math.exp %15 : vector<64x128xf32>
    %17 = arith.mulf %4, %6 : vector<64x32xf32>
    %cst_6 = arith.constant dense<0.000000e+00> : vector<64xf32>
    %18 = vector.multi_reduction <add>, %17, %cst_6 [1] : vector<64x32xf32> to vector<64xf32>
    %19 = vector.shape_cast %18 : vector<64xf32> to vector<64x1xf32>
    %20 = arith.mulf %19, %11 : vector<64x1xf32>
    %cst_7 = arith.constant 1.000000e+00 : f32
    %21 = vector.broadcast %cst_7 : f32 to vector<64x1xf32>
    %22 = arith.subf %20, %21 : vector<64x1xf32>
    %23 = math.exp %22 : vector<64x1xf32>
    %c0_8 = arith.constant 0 : index
    %c0_9 = arith.constant 0 : index
    %24 = vector.load %arg1[%c0_8, %c0_9] : memref<64x1xi32, #tpu.memory_space<vmem>>, vector<64x1xi32>
    %c0_10 = arith.constant 0 : index
    %c0_11 = arith.constant 0 : index
    %25 = vector.load %arg2[%c0_10, %c0_11] : memref<1x128xi32, #tpu.memory_space<vmem>>, vector<1x128xi32>
    %26 = vector.broadcast %24 : vector<64x1xi32> to vector<64x128xi32>
    %27 = vector.broadcast %25 : vector<1x128xi32> to vector<64x128xi32>
    %28 = arith.cmpi eq, %26, %27 : vector<64x128xi32>
    %cst_12 = arith.constant dense<0.000000e+00> : vector<64xf32>
    %29 = vector.multi_reduction <add>, %16, %cst_12 [1] : vector<64x128xf32> to vector<64xf32>
    %30 = vector.shape_cast %29 : vector<64xf32> to vector<64x1xf32>
    %cst_13 = arith.constant 0.000000e+00 : f32
    %31 = vector.broadcast %cst_13 : f32 to vector<64x128xf32>
    %32 = arith.select %28, %16, %31 : vector<64x128xi1>, vector<64x128xf32>
    %cst_14 = arith.constant dense<0.000000e+00> : vector<64xf32>
    %33 = vector.multi_reduction <add>, %32, %cst_14 [1] : vector<64x128xf32> to vector<64xf32>
    %34 = vector.shape_cast %33 : vector<64xf32> to vector<64x1xf32>
    %35 = arith.subf %30, %23 : vector<64x1xf32>
    %36 = arith.subf %34, %23 : vector<64x1xf32>
    %cst_15 = arith.constant 1.000000e-07 : f32
    %37 = vector.broadcast %cst_15 : f32 to vector<64x1xf32>
    %38 = arith.mulf %37, %35 : vector<64x1xf32>
    %39 = arith.addf %36, %38 : vector<64x1xf32>
    %40 = arith.divf %39, %35 : vector<64x1xf32>
    %41 = math.log %40 : vector<64x1xf32>
    %c0_16 = arith.constant 0 : index
    %c0_17 = arith.constant 0 : index
    %42 = vector.load %arg4[%c0_16, %c0_17] : memref<64x1xf32, #tpu.memory_space<vmem>>, vector<64x1xf32>
    tpu.vector_store %arg4[%c0_16, %c0_17], %41 {strides = array<i32>} : memref<64x1xf32, #tpu.memory_space<vmem>>, vector<64x1xf32>,
    return
  }
  func.func @transform_0(%arg0: i32) -> (i32, i32) {
    %c0_i32 = arith.constant 0 : i32
    %c0_i32_0 = arith.constant 0 : i32
    return %arg0, %c0_i32 : i32, i32
  }
  func.func @transform_1(%arg0: i32) -> (i32, i32) {
    %c0_i32 = arith.constant 0 : i32
    %c0_i32_0 = arith.constant 0 : i32
    %c0_i32_1 = arith.constant 0 : i32
    return %c0_i32, %c0_i32_0 : i32, i32
  }
  func.func @transform_2(%arg0: i32) -> (i32, i32) {
    %c0_i32 = arith.constant 0 : i32
    %c0_i32_0 = arith.constant 0 : i32
    %c0_i32_1 = arith.constant 0 : i32
    return %c0_i32, %c0_i32_0 : i32, i32
  }
  func.func @transform_3(%arg0: i32) -> (i32, i32) {
    %c0_i32 = arith.constant 0 : i32
    %c0_i32_0 = arith.constant 0 : i32
    return %arg0, %c0_i32 : i32, i32
  }
}

</mosaic_0001>

<bundles_post_ra>
// kernel: tpu_custom_call.1
= control target key start
LH: loop header
LB: loop body
LE: loop exit
PB: predicated region body
PF: predicated region fallthrough
CT: control target
= control target key end

     0   :  { %s1035_s12 = smov 0   ;;  %s1338_s0 = inlined_call_operand.vmem [shape: s32[128,1], index: 0, kind: input, shape index: {}]   ;;  %s1339_s1 = inlined_call_operand.vmem [shape: s32[1,128], index: 1, kind: input, shape index: {}]   ;;  %s1340_s2 = inlined_call_operand.vmem [shape: f32[128,32], index: 2, kind: input, shape index: {}]   ;;  %s1341_s3 = inlined_call_operand.vmem [shape: f32[128,1], index: 3, kind: output, shape index: {}]  }
   0x1 LB: > { %s730_s13 = sadd.s32 4294967295, %s1012_s12   ;;  %p734_p0 = scmp.ge.s32.totalorder %s1012_s12, 1  ;;  %s1012_s12 = sphi %s1035_s12, %s13_s12  }
   0x2   : > { %p138_p1 = scmp.lt.s32.totalorder %s1012_s12, 3 }
   0x4   : > { %p139_p2 = pnand %p734_p0, %p138_p1 }
   0x5   : > { %v175_v0 = vld [vmem:[%s1340_s2] sm:$0xff] (!%p139_p2)  ;;  %v176_v1 = vld [vmem:[%s1340_s2 + $0x8] sm:$0xff] (!%p139_p2)  ;;  %vm208_vm0 = vcmask (!%p139_p2), 261120   ;;  %v177_v2 = vld [vmem:[%s1340_s2 + $0x10] sm:$0xff] (!%p139_p2)  ;;  %s739_s20 = sshll.u32 (!%p139_p2), %s730_s13, 6  ;;  %v1014_v41 = vmov (!%p139_p2), 0  }
   0x6   : > { %142 = sbr.rel (%p139_p2) target bundleno = 648 (0x288), region = 32  ;;  %v851_v3 = vpack.c.bf16 (!%p139_p2), %v176_v1, %v175_v0  ;;  %vm1056_vm1 = vmpackc.low (!%p139_p2), %vm208_vm0, %vm208_vm0  ;;  %v178_v5 = vld [vmem:[%s1340_s2 + $0x18] sm:$0xff] (!%p139_p2)  ;;  %s1066_s25 = scalar_lea.vmem (!%p139_p2), %s1340_s2, %s739_s20  ;;  %v179_v8 = vld [vmem:[%s1340_s2 + $0x20] sm:$0xff] (!%p139_p2)  ;;  %925 = vset.pattern.permute.xlu1 (!%p139_p2), %v1014_v41  ;;  %924 = vset.pattern.permute.xlu0 (!%p139_p2), %v1014_v41  ;;  %vm663_vm10 = vcmask (!%p139_p2), 7168  }
   0x7   : > { %v857_v6 = vpack.c.bf16 (!%p139_p2), %v178_v5, %v177_v2  ;;  %v1081_v7 = vld [vmem:[%s1066_s25] sm:$0xff] (!%p139_p2)  ;;  %v180_v9 = vld [vmem:[%s1340_s2 + $0x28] sm:$0xff] (!%p139_p2)  ;;  %v181_v14 = vld [vmem:[%s1340_s2 + $0x30] sm:$0xff] (!%p139_p2) }
   0x8   : > { %853 = vmatprep.subr.msk.bf16.mxu0 (!%p139_p2), %vm1056_vm1, %v851_v3  ;;  %899 = vmatprep.subr.msk.bf16.mxu1 (!%p139_p2), %vm1056_vm1, %v851_v3  ;;  %v1090_v10 = vmul.f32 (!%p139_p2), 14.285714, %v1081_v7  ;;  %v1093_v11 = vld [vmem:[%s1066_s25 + $0x20] sm:$0xff] (!%p139_p2)  ;;  %v863_v13 = vpack.c.bf16 (!%p139_p2), %v180_v9, %v179_v8  ;;  %v182_v15 = vld [vmem:[%s1340_s2 + $0x38] sm:$0xff] (!%p139_p2)  ;;  %v184_v18 = vld [vmem:[%s1340_s2 + $0x48] sm:$0xff] (!%p139_p2) }
   0x9   : > { %856 = vmatpush3.bf16.xpose.msk.msra.mxu0 (!%p139_p2), %vm1056_vm1, %v851_v3  ;;  %907 = vmatpush3.bf16.xpose.msk.msra.mxu1 (!%p139_p2), %vm1056_vm1, %v851_v3  ;;  %v1096_v12 = vmul.f32 (!%p139_p2), 14.285714, %v1093_v11  ;;  %v869_v16 = vpack.c.bf16 (!%p139_p2), %v182_v15, %v181_v14  ;;  %v183_v17 = vld [vmem:[%s1340_s2 + $0x40] sm:$0xff] (!%p139_p2)  ;;  %v185_v20 = vld [vmem:[%s1340_s2 + $0x50] sm:$0xff] (!%p139_p2)  ;;  %v186_v21 = vld [vmem:[%s1340_s2 + $0x58] sm:$0xff] (!%p139_p2) }
   0xa   : > { %859 = vmatprep.subr.msk.bf16.mxu0 (!%p139_p2), %vm1056_vm1, %v857_v6  ;;  %900 = vmatprep.subr.msk.bf16.mxu1 (!%p139_p2), %vm1056_vm1, %v857_v6  ;;  %v875_v19 = vpack.c.bf16 (!%p139_p2), %v184_v18, %v183_v17  ;;  %v881_v22 = vpack.c.bf16 (!%p139_p2), %v186_v21, %v185_v20  ;;  %v187_v23 = vld [vmem:[%s1340_s2 + $0x60] sm:$0xff] (!%p139_p2)  ;;  %v188_v24 = vld [vmem:[%s1340_s2 + $0x68] sm:$0xff] (!%p139_p2)  ;;  %v189_v26 = vld [vmem:[%s1340_s2 + $0x70] sm:$0xff] (!%p139_p2)  ;;  %v450_v2 = vmul.f32 (!%p139_p2), %v1090_v10, %v1081_v7 }
   0xb   : > { %839 = vmatprep.mubr.msk.f32.mxu0 (!%p139_p2), %vm208_vm0, %v1090_v10  ;;  %845 = vmatprep.mubr.msk.f32.mxu1 (!%p139_p2), %vm208_vm0, %v1096_v12  ;;  %v887_v25 = vpack.c.bf16 (!%p139_p2), %v188_v24, %v187_v23  ;;  %v190_v27 = vld [vmem:[%s1340_s2 + $0x78] sm:$0xff] (!%p139_p2)  ;;  %v193_v29 = vld [vmem:[%s1066_s25 + $0x8] sm:$0xff] (!%p139_p2)  ;;  %v194_v31 = vld [vmem:[%s1066_s25 + $0x10] sm:$0xff] (!%p139_p2)  ;;  %v454_v62 = vmul.f32 (!%p139_p2), %v1096_v12, %v1093_v11 }
   0xc   : > { %v893_v28 = vpack.c.bf16 (!%p139_p2), %v190_v27, %v189_v26  ;;  %v1186_v30 = vld [vmem:[%s1066_s25 + $0x28] sm:$0xff] (!%p139_p2)  ;;  %v1190_v32 = vld [vmem:[%s1066_s25 + $0x30] sm:$0xff] (!%p139_p2)  ;;  %v201_v33 = vmul.f32 (!%p139_p2), 14.285714, %v193_v29  ;;  %v202_v35 = vmul.f32 (!%p139_p2), 14.285714, %v194_v31 }
   0xd   : > { %v1193_v34 = vmul.f32 14.285714, %v1186_v30  ;;  %v1196_v36 = vld [vmem:[%s1066_s25 + $0x18] sm:$0xff]  ;;  %v206_v37 = vmul.f32 14.285714, %v1190_v32  ;;  %v470_v63 = vsel %vm208_vm0, %v454_v62, 0.0 }
   0xe   : > { %v1200_v38 = vld [vmem:[%s1066_s25 + $0x38] sm:$0xff]  ;;  %v203_v39 = vmul.f32 14.285714, %v1196_v36  ;;  %s735_s25 = sshll.u32 %s730_s13, 3  ;;  %v451_v58 = vmul.f32 %v201_v33, %v193_v29  ;;  %v452_v60 = vmul.f32 %v202_v35, %v194_v31  ;;  %v458_v3 = vsel %vm208_vm0, %v450_v2, 0.0 }
   0xf   : > { %v1207_v40 = vmul.f32 14.285714, %v1200_v38  ;;  %p163_p3 = scmp.lt.s32.totalorder %s735_s25, 15  ;;  %v456_v0 = vmul.f32 %v206_v37, %v1190_v32 }
  0x10   : > { %v461_v59 = vsel %vm208_vm0, %v451_v58, 0.0  ;;  %v464_v61 = vsel %vm208_vm0, %v452_v60, 0.0  ;;  %v453_v4 = vmul.f32 %v203_v39, %v1196_v36 }
  0x11   : > { %862 = vmatpush3.bf16.xpose.msk.msra.mxu0 %vm1056_vm1, %v857_v6  ;;  %908 = vmatpush3.bf16.xpose.msk.msra.mxu1 %vm1056_vm1, %v857_v6  ;;  %s1345_s25 = smov (!%p163_p3, %s735_s25), 15  ;;  %v476_v1 = vsel %vm208_vm0, %v456_v0, 0.0  ;;  %v455_v6 = vmul.f32 %v1193_v34, %v1186_v30  ;;  %v457_v9 = vmul.f32 %v1207_v40, %v1200_v38 }
  0x12   : > { %865 = vmatprep.subr.msk.bf16.mxu0 %vm1056_vm1, %v863_v13  ;;  %901 = vmatprep.subr.msk.bf16.mxu1 %vm1056_vm1, %v863_v13  ;;  %s736_s26 = sshll.u32 %s1345_s25, 3  ;;  %v467_v5 = vsel %vm208_vm0, %v453_v4, 0.0 }
  0x13   : > { %s166_s29 = scalar_lea.vmem %s1338_s0, %s736_s26  ;;  %v473_v8 = vsel %vm208_vm0, %v455_v6, 0.0  ;;  %v479_v11 = vsel %vm208_vm0, %v457_v9, 0.0  ;;  %s1317_s6 = scalar_lea.vmem %s1341_s3, %s736_s26 }
  0x14   : > { %v515_v50 = vld [vmem:[%s166_s29 + $0x8] sm:$0xff]  ;;  %v516_v51 = vld [vmem:[%s166_s29 + $0x10] sm:$0xff]  ;;  %v514_v52 = vld [vmem:[%s166_s29] sm:$0xff] }
  0x15   : > { %v517_v53 = vld [vmem:[%s166_s29 + $0x18] sm:$0xff]  ;;  %v518_v54 = vld [vmem:[%s166_s29 + $0x20] sm:$0xff]  ;;  %v519_v55 = vld [vmem:[%s166_s29 + $0x28] sm:$0xff] }
  0x16   : > { %v520_v56 = vld [vmem:[%s166_s29 + $0x30] sm:$0xff]  ;;  %v521_v57 = vld [vmem:[%s166_s29 + $0x38] sm:$0xff] }
  0x19   : > { %868 = vmatpush3.bf16.xpose.msk.msra.mxu0 %vm1056_vm1, %v863_v13  ;;  %909 = vmatpush3.bf16.xpose.msk.msra.mxu1 %vm1056_vm1, %v863_v13 }
  0x1a   : > { %871 = vmatprep.subr.msk.bf16.mxu0 %vm1056_vm1, %v869_v16  ;;  %902 = vmatprep.subr.msk.bf16.mxu1 %vm1056_vm1, %v869_v16 }
  0x21   : > { %874 = vmatpush3.bf16.xpose.msk.msra.mxu0 %vm1056_vm1, %v869_v16  ;;  %910 = vmatpush3.bf16.xpose.msk.msra.mxu1 %vm1056_vm1, %v869_v16 }
  0x22   : > { %877 = vmatprep.subr.msk.bf16.mxu0 %vm1056_vm1, %v875_v19  ;;  %903 = vmatprep.subr.msk.bf16.mxu1 %vm1056_vm1, %v875_v19 }
  0x29   : > { %880 = vmatpush3.bf16.xpose.msk.msra.mxu0 %vm1056_vm1, %v875_v19  ;;  %911 = vmatpush3.bf16.xpose.msk.msra.mxu1 %vm1056_vm1, %v875_v19 }
  0x2a   : > { %883 = vmatprep.subr.msk.bf16.mxu0 %vm1056_vm1, %v881_v22  ;;  %904 = vmatprep.subr.msk.bf16.mxu1 %vm1056_vm1, %v881_v22 }
  0x31   : > { %886 = vmatpush3.bf16.xpose.msk.msra.mxu0 %vm1056_vm1, %v881_v22  ;;  %912 = vmatpush3.bf16.xpose.msk.msra.mxu1 %vm1056_vm1, %v881_v22 }
  0x32   : > { %889 = vmatprep.subr.msk.bf16.mxu0 %vm1056_vm1, %v887_v25  ;;  %905 = vmatprep.subr.msk.bf16.mxu1 %vm1056_vm1, %v887_v25 }
  0x39   : > { %892 = vmatpush3.bf16.xpose.msk.msra.mxu0 %vm1056_vm1, %v887_v25  ;;  %913 = vmatpush3.bf16.xpose.msk.msra.mxu1 %vm1056_vm1, %v887_v25 }
  0x3a   : > { %895 = vmatprep.subr.msk.bf16.mxu0 %vm1056_vm1, %v893_v28  ;;  %906 = vmatprep.subr.msk.bf16.mxu1 %vm1056_vm1, %v893_v28 }
  0x41   : > { %898 = vmatpush3.bf16.xpose.msk.msra.mxu0 %vm1056_vm1, %v893_v28  ;;  %914 = vmatpush3.bf16.xpose.msk.msra.mxu1 %vm1056_vm1, %v893_v28 }
  0x48   : > { %840 = vmatmul.mubr.msk.f32.vlgmr.msra.gmra.mrb[0].mxu0 %vm208_vm0, %v201_v33  ;;  %846 = vmatmul.mubr.msk.f32.vlgmr.msra.gmra.mrb[0].mxu1 %vm208_vm0, %v1193_v34 }
  0x49   : > { %842 = vmatprep.mubr.msk.f32.mxu0 %vm208_vm0, %v202_v35  ;;  %848 = vmatprep.mubr.msk.f32.mxu1 %vm208_vm0, %v206_v37 }
  0x4c   : > { %843 = vmatmul.mubr.msk.f32.gmra.mrb[2].mxu0 %vm208_vm0, %v203_v39  ;;  %849 = vmatmul.mubr.msk.f32.gmra.mrb[2].mxu1 %vm208_vm0, %v1207_v40 }
 0x11b   : > { %v1214_v42 = vpop.f32.mrb[0].mxu0  ;;  %v1216_v43 = vpop.f32.mrb[0].mxu1 }
 0x11c   : > { %396 = vmax.xlane.f32.xlu1 %v1216_v43  ;;  %388 = vmax.xlane.f32.xlu0 %v1214_v42  ;;  %v1220_v44 = vpop.f32.mrb[1].mxu0  ;;  %v1222_v45 = vpop.f32.mrb[1].mxu1 }
 0x11f   : > { %v1224_v46 = vpop.f32.mrb[2].mxu0  ;;  %v1226_v47 = vpop.f32.mrb[2].mxu1 }
 0x120   : > { %386 = vmax.xlane.f32.xlu0 %v1220_v44  ;;  %392 = vmax.xlane.f32.xlu1 %v1224_v46  ;;  %v1230_v48 = vpop.f32.mrb[3].mxu0  ;;  %v1232_v49 = vpop.f32.mrb[3].mxu1 }
 0x124   : > { %394 = vmax.xlane.f32.xlu0 %v1222_v45  ;;  %400 = vmax.xlane.f32.xlu1 %v1226_v47 }
 0x128   : > { %398 = vmax.xlane.f32.xlu0 %v1232_v49  ;;  %390 = vmax.xlane.f32.xlu1 %v1230_v48 }
 0x139   : > { %527 = vperm.xlu1 %925, %v515_v50  }
 0x13d   : > { %530 = vperm.xlu1 %925, %v516_v51  }
 0x13e   : > { %524 = vperm.xlu0 %924, %v514_v52  }
 0x141   : > { %533 = vperm.xlu1 %925, %v517_v53  }
 0x145   : > { %536 = vperm.xlu1 %925, %v518_v54   ;;  %v780_v54 = vld [vmem:[%s1339_s1] ss:$0 sm:$0xff] }
 0x149   : > { %539 = vperm.xlu1 %925, %v519_v55  }
 0x14d   : > { %542 = vperm.xlu1 %925, %v520_v56  }
 0x151   : > { %545 = vperm.xlu1 %925, %v521_v57  }
 0x15d   : > { %462 = vadd.xlane.f32.xlu0 %v461_v59 }
 0x161   : > { %465 = vadd.xlane.f32.xlu0 %v464_v61 }
 0x165   : > { %471 = vadd.xlane.f32.xlu0 %v470_v63 }
 0x169   : > { %477 = vadd.xlane.f32.xlu0 %v476_v1 }
 0x175   : > { %459 = vadd.xlane.f32.xlu1 %v458_v3 }
 0x179   : > { %468 = vadd.xlane.f32.xlu1 %v467_v5 }
 0x17d   : > { %474 = vadd.xlane.f32.xlu1 %v473_v8 }
 0x181   : > { %480 = vadd.xlane.f32.xlu1 %v479_v11 }
 0x1a9   : > { %v397_v7 = vpop.xlane.xlu1 %396  ;;  %v389_v10 = vpop.xlane.xlu0 %388 }
 0x1aa   : > { %926 = vrcp.f32 %v397_v7 }
 0x1ab   : > { %928 = vrcp.f32 %v389_v10 }
 0x1ad   : > { %v387_v12 = vpop.xlane.xlu0 %386  ;;  %v393_v13 = vpop.xlane.xlu1 %392 }
 0x1ae   : > { %930 = vrcp.f32 %v387_v12 }
 0x1af   : > { %932 = vrcp.f32 %v393_v13 }
 0x1b1   : > { %v395_v14 = vpop.xlane.xlu0 %394  ;;  %v401_v15 = vpop.xlane.xlu1 %400 }
 0x1b2   : > { %934 = vrcp.f32 %v395_v14 }
 0x1b3   : > { %936 = vrcp.f32 %v401_v15 }
 0x1b4   : > { %v1266_v16 = vpop.eup %926 }
 0x1b5   : > { %v1268_v17 = vpop.eup %928  ;;  %v423_v18 = vmul.f32 %v1266_v16, %v1216_v43  ;;  %v399_v19 = vpop.xlane.xlu0 %398 }
 0x1b6   : > { %v391_v20 = vpop.xlane.xlu1 %390  ;;  %v419_v21 = vmul.f32 %v1268_v17, %v1214_v42  ;;  %938 = vrcp.f32 %v399_v19 }
 0x1b7   : > { %940 = vrcp.f32 %v391_v20  ;;  %v769_v24 = vadd.f32 -1.0, %v423_v18 }
 0x1b8   : > { %v1274_v22 = vpop.eup %930  ;;  %v765_v23 = vadd.f32 -1.0, %v419_v21 }
 0x1b9   : > { %v1276_v25 = vpop.eup %932  ;;  %v418_v26 = vmul.f32 %v1274_v22, %v1220_v44  ;;  %v444_v32 = vmul.f32 1.442695, %v769_v24 }
 0x1ba   : > { %v528_v27 = vpop.permute.xlu1 %527  ;;  %v436_v28 = vmul.f32 1.442695, %v765_v23  ;;  %v421_v31 = vmul.f32 %v1276_v25, %v1224_v46 }
 0x1bb   : > { %v764_v29 = vadd.f32 -1.0, %v418_v26  ;;  %vm552_vm2 = vcmp.eq.s32.totalorder %v528_v27, %v780_v54 }
 0x1bc   : > { %v1280_v30 = vpop.eup %934  ;;  %942 = vpow2.f32 %v436_v28  ;;  %v767_v40 = vadd.f32 -1.0, %v421_v31 }
 0x1bd   : > { %v1284_v33 = vpop.eup %936  ;;  %v422_v34 = vmul.f32 %v1280_v30, %v1222_v45  ;;  %v434_v35 = vmul.f32 1.442695, %v764_v29 }
 0x1be   : > { %v1288_v36 = vpop.permute.xlu1 %530  ;;  %v425_v39 = vmul.f32 %v1284_v33, %v1226_v47  ;;  %v440_v46 = vmul.f32 1.442695, %v767_v40 }
 0x1bf   : > { %944 = vpow2.f32 %v434_v35  ;;  %v768_v37 = vadd.f32 -1.0, %v422_v34  ;;  %vm553_vm8 = vcmp.eq.s32.totalorder %v1288_v36, %v780_v54 }
 0x1c0   : > { %v1290_v38 = vpop.eup %938  ;;  %946 = vpow2.f32 %v444_v32  ;;  %v771_v50 = vadd.f32 -1.0, %v425_v39 }
 0x1c1   : > { %v1294_v41 = vpop.eup %940  ;;  %v442_v42 = vmul.f32 1.442695, %v768_v37  ;;  %v424_v44 = vmul.f32 %v1290_v38, %v1232_v49  ;;  %v525_v49 = vpop.permute.xlu0 %524 }
 0x1c2   : > { %v420_v43 = vmul.f32 %v1294_v41, %v1230_v48  ;;  %v534_v45 = vpop.permute.xlu1 %533  ;;  %v448_v55 = vmul.f32 1.442695, %v771_v50  ;;  %vm551_vm3 = vcmp.eq.s32.totalorder %v525_v49, %v780_v54 }
 0x1c3   : > { %948 = vpow2.f32 %v442_v42  ;;  %v770_v47 = vadd.f32 -1.0, %v424_v44  ;;  %vm554_vm6 = vcmp.eq.s32.totalorder %v534_v45, %v780_v54 }
 0x1c4   : > { %v766_v51 = vadd.f32 -1.0, %v420_v43  ;;  %950 = vpow2.f32 %v440_v46 }
 0x1c5   : > { %v446_v58 = vmul.f32 1.442695, %v770_v47 }
 0x1c6   : > { %v943_v52 = vpop.eup %942  ;;  %v438_v53 = vmul.f32 1.442695, %v766_v51  ;;  %v537_v57 = vpop.permute.xlu1 %536 }
 0x1c7   : > { %561 = vadd.xlane.f32.xlu1 %v943_v52  ;;  %v576_v60 = vsel %vm552_vm2, %v943_v52, 0.0  ;;  %vm555_vm5 = vcmp.eq.s32.totalorder %v537_v57, %v780_v54 }
 0x1c8   : > { %952 = vpow2.f32 %v438_v53 }
 0x1c9   : > { %v945_v56 = vpop.eup %944  ;;  %954 = vpow2.f32 %v448_v55 }
 0x1ca   : > { %v947_v48 = vpop.eup %946  ;;  %559 = vadd.xlane.f32.xlu0 %v945_v56  ;;  %956 = vpow2.f32 %v446_v58  ;;  %v540_v61 = vpop.permute.xlu1 %539  ;;  %v575_v62 = vsel %vm551_vm3, %v945_v56, 0.0 }
 0x1cb   : > { %569 = vadd.xlane.f32.xlu1 %v947_v48  ;;  %vm556_vm4 = vcmp.eq.s32.totalorder %v540_v61, %v780_v54 }
 0x1cc   : > { %v580_v4 = vsel %vm556_vm4, %v947_v48, 0.0 }
 0x1cd   : > { %v949_v59 = vpop.eup %948 }
 0x1ce   : > { %567 = vadd.xlane.f32.xlu0 %v949_v59  ;;  %v951_v63 = vpop.eup %950  ;;  %v543_v2 = vpop.permute.xlu1 %542  ;;  %v579_v6 = vsel %vm555_vm5, %v949_v59, 0.0 }
 0x1cf   : > { %585 = vadd.xlane.f32.xlu1 %v576_v60  ;;  %v578_v8 = vsel %vm554_vm6, %v951_v63, 0.0  ;;  %vm557_vm9 = vcmp.eq.s32.totalorder %v543_v2, %v780_v54 }
 0x1d2   : > { %583 = vadd.xlane.f32.xlu0 %v575_v62  ;;  %v953_v0 = vpop.eup %952  ;;  %v546_v5 = vpop.permute.xlu1 %545 }
 0x1d3   : > { %565 = vadd.xlane.f32.xlu1 %v951_v63  ;;  %v955_v1 = vpop.eup %954  ;;  %vm558_vm7 = vcmp.eq.s32.totalorder %v546_v5, %v780_v54  ;;  %v577_v9 = vsel %vm553_vm8, %v953_v0, 0.0 }
 0x1d4   : > { %v957_v3 = vpop.eup %956  ;;  %v582_v11 = vsel %vm558_vm7, %v955_v1, 0.0 }
 0x1d5   : > { %v581_v7 = vsel %vm557_vm9, %v957_v3, 0.0 }
 0x1d6   : > { %563 = vadd.xlane.f32.xlu0 %v953_v0 }
 0x1d7   : > { %573 = vadd.xlane.f32.xlu1 %v955_v1 }
 0x1da   : > { %571 = vadd.xlane.f32.xlu0 %v957_v3 }
 0x1db   : > { %593 = vadd.xlane.f32.xlu1 %v580_v4 }
 0x1de   : > { %591 = vadd.xlane.f32.xlu0 %v579_v6 }
 0x1df   : > { %589 = vadd.xlane.f32.xlu1 %v578_v8 }
 0x1e2   : > { %587 = vadd.xlane.f32.xlu0 %v577_v9 }
 0x1e3   : > { %597 = vadd.xlane.f32.xlu1 %v582_v11 }
 0x1e6   : > { %595 = vadd.xlane.f32.xlu0 %v581_v7 }
 0x1ea   : > { %v463_v12 = vpop.xlane.xlu0 %462 }
 0x1eb   : > { %v483_v13 = vmul.f32 %v1268_v17, %v463_v12 }
 0x1ed   : > { %v773_v19 = vadd.f32 -1.0, %v483_v13 }
 0x1ee   : > { %v466_v15 = vpop.xlane.xlu0 %465 }
 0x1ef   : > { %v500_v23 = vmul.f32 1.442695, %v773_v19  ;;  %v484_v17 = vmul.f32 %v1294_v41, %v466_v15 }
 0x1f1   : > { %958 = vpow2.f32 %v500_v23  ;;  %v774_v39 = vadd.f32 -1.0, %v484_v17 }
 0x1f2   : > { %v472_v24 = vpop.xlane.xlu0 %471 }
 0x1f3   : > { %v486_v27 = vmul.f32 %v1280_v30, %v472_v24  ;;  %v502_v44 = vmul.f32 1.442695, %v774_v39 }
 0x1f5   : > { %v776_v34 = vadd.f32 -1.0, %v486_v27 }
 0x1f6   : > { %v478_v35 = vpop.xlane.xlu0 %477 }
 0x1f7   : > { %v506_v40 = vmul.f32 1.442695, %v776_v34 }
 0x1fb   : > { %v959_v43 = vpop.eup %958 }
 0x202   : > { %v460_v10 = vpop.xlane.xlu1 %459 }
 0x203   : > { %v482_v18 = vmul.f32 %v1274_v22, %v460_v10 }
 0x205   : > { %v772_v21 = vadd.f32 -1.0, %v482_v18 }
 0x206   : > { %v469_v14 = vpop.xlane.xlu1 %468 }
 0x207   : > { %v498_v28 = vmul.f32 1.442695, %v772_v21  ;;  %v485_v29 = vmul.f32 %v1276_v25, %v469_v14 }
 0x209   : > { %960 = vpow2.f32 %v498_v28  ;;  %v775_v22 = vadd.f32 -1.0, %v485_v29 }
 0x20a   : > { %v475_v20 = vpop.xlane.xlu1 %474 }
 0x20b   : > { %v487_v26 = vmul.f32 %v1266_v16, %v475_v20  ;;  %v488_v16 = vmul.f32 %v1290_v38, %v478_v35  ;;  %v504_v30 = vmul.f32 1.442695, %v775_v22 }
 0x20d   : > { %v777_v31 = vadd.f32 -1.0, %v487_v26  ;;  %v778_v41 = vadd.f32 -1.0, %v488_v16 }
 0x20e   : > { %v481_v32 = vpop.xlane.xlu1 %480 }
 0x20f   : > { %v508_v36 = vmul.f32 1.442695, %v777_v31  ;;  %v489_v37 = vmul.f32 %v1284_v33, %v481_v32  ;;  %v510_v53 = vmul.f32 1.442695, %v778_v41 }
 0x211   : > { %962 = vpow2.f32 %v508_v36  ;;  %v779_v42 = vadd.f32 -1.0, %v489_v37 }
 0x212   : > { %964 = vpow2.f32 %v506_v40 }
 0x213   : > { %966 = vpow2.f32 %v504_v30  ;;  %v961_v46 = vpop.eup %960  ;;  %v512_v50 = vmul.f32 1.442695, %v779_v42 }
 0x21b   : > { %v963_v54 = vpop.eup %962 }
 0x21c   : > { %v965_v57 = vpop.eup %964 }
 0x21d   : > { %v967_v59 = vpop.eup %966 }
 0x254   : > { %v562_v25 = vpop.xlane.xlu1 %561 }
 0x255   : > { %v600_v45 = vsub.f32 %v562_v25, %v959_v43 }
 0x257   : > { %968 = vrcp.f32 %v600_v45  ;;  %v560_v51 = vpop.xlane.xlu0 %559  ;;  %v616_v55 = vmul.f32 1e-07, %v600_v45 }
 0x258   : > { %v570_v52 = vpop.xlane.xlu1 %569  ;;  %v599_v33 = vsub.f32 %v560_v51, %v961_v46  ;;  %970 = vpow2.f32 %v502_v44 }
 0x259   : > { %v604_v48 = vsub.f32 %v570_v52, %v963_v54 }
 0x25a   : > { %972 = vrcp.f32 %v599_v33  ;;  %v615_v60 = vmul.f32 1e-07, %v599_v33 }
 0x25b   : > { %974 = vpow2.f32 %v512_v50  ;;  %v568_v38 = vpop.xlane.xlu0 %567  ;;  %v620_v15 = vmul.f32 1e-07, %v604_v48 }
 0x25c   : > { %v586_v47 = vpop.xlane.xlu1 %585  ;;  %976 = vpow2.f32 %v510_v53  ;;  %v603_v0 = vsub.f32 %v568_v38, %v965_v57 }
 0x25d   : > { %v608_v56 = vsub.f32 %v586_v47, %v959_v43  ;;  %978 = vrcp.f32 %v604_v48 }
 0x25e   : > { %v619_v24 = vmul.f32 1e-07, %v603_v0 }
 0x25f   : > { %v624_v49 = vadd.f32 %v616_v55, %v608_v56  ;;  %v584_v58 = vpop.xlane.xlu0 %583 }
 0x260   : > { %v566_v61 = vpop.xlane.xlu1 %565  ;;  %v607_v62 = vsub.f32 %v584_v58, %v961_v46 }
 0x261   : > { %v969_v63 = vpop.eup %968  ;;  %v602_v2 = vsub.f32 %v566_v61, %v967_v59 }
 0x262   : > { %v634_v1 = vmul.f32 %v969_v63, %v624_v49  ;;  %v623_v3 = vadd.f32 %v615_v60, %v607_v62  ;;  %v971_v4 = vpop.eup %970 }
 0x263   : > { %v564_v5 = vpop.xlane.xlu0 %563  ;;  %v618_v28 = vmul.f32 1e-07, %v602_v2 }
 0x264   : > { %v973_v6 = vpop.eup %972  ;;  %980 = vlog2.f32 %v634_v1  ;;  %v574_v8 = vpop.xlane.xlu1 %573  ;;  %v601_v7 = vsub.f32 %v564_v5, %v971_v4 }
 0x265   : > { %v975_v9 = vpop.eup %974  ;;  %982 = vrcp.f32 %v603_v0  ;;  %v632_v11 = vmul.f32 %v973_v6, %v623_v3 }
 0x266   : > { %984 = vrcp.f32 %v602_v2  ;;  %v606_v10 = vsub.f32 %v574_v8, %v975_v9  ;;  %v977_v13 = vpop.eup %976  ;;  %v617_v39 = vmul.f32 1e-07, %v601_v7 }
 0x267   : > { %986 = vlog2.f32 %v632_v11  ;;  %v572_v12 = vpop.xlane.xlu0 %571  ;;  %v979_v23 = vpop.eup %978 }
 0x268   : > { %v594_v14 = vpop.xlane.xlu1 %593  ;;  %988 = vrcp.f32 %v601_v7  ;;  %v605_v19 = vsub.f32 %v572_v12, %v977_v13  ;;  %v622_v43 = vmul.f32 1e-07, %v606_v10 }
 0x269   : > { %v612_v18 = vsub.f32 %v594_v14, %v963_v54  ;;  %990 = vrcp.f32 %v606_v10 }
 0x26a   : > { %992 = vrcp.f32 %v605_v19  ;;  %v621_v33 = vmul.f32 1e-07, %v605_v19 }
 0x26b   : > { %v628_v20 = vadd.f32 %v620_v15, %v612_v18  ;;  %v592_v21 = vpop.xlane.xlu0 %591 }
 0x26c   : > { %v590_v26 = vpop.xlane.xlu1 %589  ;;  %v611_v27 = vsub.f32 %v592_v21, %v965_v57 }
 0x26d   : > { %v642_v29 = vmul.f32 %v979_v23, %v628_v20  ;;  %v610_v31 = vsub.f32 %v590_v26, %v967_v59 }
 0x26e   : > { %v981_v32 = vpop.eup %980  ;;  %v627_v17 = vadd.f32 %v619_v24, %v611_v27 }
 0x26f   : > { %v983_v34 = vpop.eup %982  ;;  %v650_v22 = vmul.f32 0.6931472, %v981_v32  ;;  %994 = vlog2.f32 %v642_v29  ;;  %v626_v35 = vadd.f32 %v618_v28, %v610_v31  ;;  %v588_v36 = vpop.xlane.xlu0 %587 }
 0x270   : > { %v985_v37 = vpop.eup %984  ;;  %v640_v40 = vmul.f32 %v983_v34, %v627_v17  ;;  %v598_v16 = vpop.xlane.xlu1 %597  ;;  %v609_v30 = vsub.f32 %v588_v36, %v971_v4 }
 0x271   : > { %v987_v42 = vpop.eup %986  ;;  %665 = vst.msk [vmem:[%s1317_s6 + $0x8] sm:$0xff] %vm663_vm10, %v650_v22  ;;  %v638_v25 = vmul.f32 %v985_v37, %v626_v35  ;;  %v614_v44 = vsub.f32 %v598_v16, %v975_v9 }
 0x272   : > { %v648_v45 = vmul.f32 0.6931472, %v987_v42  ;;  %996 = vlog2.f32 %v640_v40  ;;  %v625_v41 = vadd.f32 %v617_v39, %v609_v30  ;;  %v989_v46 = vpop.eup %988 }
 0x273   : > { %998 = vlog2.f32 %v638_v25  ;;  %v630_v50 = vadd.f32 %v622_v43, %v614_v44  ;;  %v596_v51 = vpop.xlane.xlu0 %595  ;;  %v991_v52 = vpop.eup %990 }
 0x274   : > { %664 = vst.msk [vmem:[%s1317_s6] sm:$0xff] %vm663_vm10, %v648_v45  ;;  %v636_v53 = vmul.f32 %v989_v46, %v625_v41  ;;  %v613_v38 = vsub.f32 %v596_v51, %v977_v13  ;;  %v993_v55 = vpop.eup %992 }
 0x275   : > { %v646_v47 = vmul.f32 %v991_v52, %v630_v50 }
 0x276   : > { %1000 = vlog2.f32 %v636_v53  ;;  %v629_v54 = vadd.f32 %v621_v33, %v613_v38 }
 0x277   : > { %1002 = vlog2.f32 %v646_v47 }
 0x278   : > { %v644_v56 = vmul.f32 %v993_v55, %v629_v54 }
 0x279   : > { %v995_v48 = vpop.eup %994 }
 0x27a   : > { %v658_v57 = vmul.f32 0.6931472, %v995_v48  ;;  %1004 = vlog2.f32 %v644_v56 }
 0x27c   : > { %v997_v49 = vpop.eup %996  ;;  %669 = vst.msk [vmem:[%s1317_s6 + $0x28] sm:$0xff] %vm663_vm10, %v658_v57 }
 0x27d   : > { %v999_v58 = vpop.eup %998  ;;  %v656_v59 = vmul.f32 0.6931472, %v997_v49 }
 0x27e   : > { %v654_v60 = vmul.f32 0.6931472, %v999_v58 }
 0x27f   : > { %668 = vst.msk [vmem:[%s1317_s6 + $0x20] sm:$0xff] %vm663_vm10, %v656_v59 }
 0x280   : > { %v1001_v61 = vpop.eup %1000  ;;  %667 = vst.msk [vmem:[%s1317_s6 + $0x18] sm:$0xff] %vm663_vm10, %v654_v60 }
 0x281   : > { %v1003_v62 = vpop.eup %1002  ;;  %v652_v63 = vmul.f32 0.6931472, %v1001_v61 }
 0x282   : > { %v662_v0 = vmul.f32 0.6931472, %v1003_v62 }
 0x283   : > { %666 = vst.msk [vmem:[%s1317_s6 + $0x10] sm:$0xff] %vm663_vm10, %v652_v63 }
 0x284   : > { %v1005_v1 = vpop.eup %1004  ;;  %671 = vst.msk [vmem:[%s1317_s6 + $0x38] sm:$0xff] %vm663_vm10, %v662_v0 }
 0x285   : > { %v660_v2 = vmul.f32 0.6931472, %v1005_v1 }
 0x287   : > { %670 = vst.msk [vmem:[%s1317_s6 + $0x30] sm:$0xff] %vm663_vm10, %v660_v2 }
 0x288 PF: > { %s13_s12 = sadd.s32 1, %s1012_s12  }
 0x289   : > { %p10_p4 = scmp.ge.s32.totalorder %s13_s12, 4  }
 0x28b   :  { %12 = sbr.rel (!%p10_p4) target bundleno = 1 (0x1), region = 63 }

</bundles_post_ra>
